<compile_context>
chip_gen: v6e
topology: v6e:2x2x1
jax: 0.10.0
libtpu: 0.0.40
codegen_flags: <defaults>
</compile_context>

<pallas_src>
import jax
import jax.numpy as jnp
from jax.experimental import pallas as pl
from jax.experimental.pallas import tpu as pltpu


def critic_q_kernel(s_ref, a_ref, w1s_ref, w1a_ref, b1_ref, w2_ref, b2_ref,
                    w3_ref, b3_ref, out_ref):
    """Fused 3-layer MLP with the input concat folded into two partial dots."""
    # Layer 1: state @ W1[:Ds] + action @ W1[Ds:] + b1  (== cat(s, a) @ W1 + b1)
    h1 = (
        jnp.dot(s_ref[...], w1s_ref[...], preferred_element_type=jnp.float32)
        + jnp.dot(a_ref[...], w1a_ref[...], preferred_element_type=jnp.float32)
        + b1_ref[...]
    )
    h1 = jnp.maximum(h1, 0.0)

    # Layer 2
    h2 = (
        jnp.dot(h1.astype(w2_ref.dtype), w2_ref[...],
                preferred_element_type=jnp.float32)
        + b2_ref[...]
    )
    h2 = jnp.maximum(h2, 0.0)

    # Output layer (N = 1): VPU multiply + lane reduction instead of MXU.
    out = jnp.sum(h2 * w3_ref[...], axis=-1, keepdims=True) + b3_ref[0, 0]
    out_ref[...] = out.astype(out_ref.dtype)


def critic_q_forward(state, action, params, *, block_b=512):
    """Batch-tiled fused forward pass.

    state:  (B, state_dim) f32
    action: (B, action_dim) f32
    params: (w1, b1, w2, b2, w3, b3) with weights stored as (fan_in, fan_out).
    """
    w1, b1, w2, b2, w3, b3 = params
    B = state.shape[0]
    state_dim = state.shape[1]
    action_dim = action.shape[1]
    H1 = w1.shape[1]
    H2 = w2.shape[1]

    # Fuse the concat: split W1 row-wise so the kernel does two partial dots.
    w1_s = w1[:state_dim, :]
    w1_a = w1[state_dim:, :]
    w3_row = w3.reshape(1, H2)  # row layout for VPU multiply + lane reduce

    # Batch tile: multiple of 8 sublanes, capped at block_b; pad B so the
    # tile evenly divides the (padded) batch.
    tb = min(block_b, pl.cdiv(B, 8) * 8)
    b_pad = pl.cdiv(B, tb) * tb
    if b_pad != B:
        pad = b_pad - B
        state = jnp.pad(state, ((0, pad), (0, 0)))
        action = jnp.pad(action, ((0, pad), (0, 0)))

    grid = (b_pad // tb,)

    vmem = pltpu.MemorySpace.VMEM
    smem = pltpu.MemorySpace.SMEM

    def resident(shape):
        # Constant block index -> fetched once, stays VMEM-resident.
        return pl.BlockSpec(shape, lambda i: (0, 0), memory_space=vmem)

    out = pl.pallas_call(
        critic_q_kernel,
        grid=grid,
        out_shape=jax.ShapeDtypeStruct((b_pad, 1), jnp.float32),
        in_specs=[
            pl.BlockSpec((tb, state_dim), lambda i: (i, 0)),   # state tile
            pl.BlockSpec((tb, action_dim), lambda i: (i, 0)),  # action tile
            resident((state_dim, H1)),                         # w1_state
            resident((action_dim, H1)),                        # w1_action
            resident((1, H1)),                                 # b1
            resident((H1, H2)),                                # w2
            resident((1, H2)),                                 # b2
            resident((1, H2)),                                 # w3 (row)
            pl.BlockSpec(memory_space=smem),                   # b3 scalar
        ],
        out_specs=pl.BlockSpec((tb, 1), lambda i: (i, 0)),
        compiler_params=pltpu.CompilerParams(
            dimension_semantics=("parallel",),
        ),
    )(state, action, w1_s, w1_a, b1, w2, b2, w3_row, b3)

    return out[:B]


def init_critic_q_params(key, in_dim, n_layer=(512, 512), init_w=0.003):
    """Deterministic init matching PyTorch semantics:
    - hidden layers: nn.Linear default U(-1/sqrt(fan_in), 1/sqrt(fan_in))
    - out layer: init_layer_uniform -> U(-init_w, init_w)
    Weights are stored transposed: (fan_in, fan_out)."""
    h1, h2 = n_layer
    keys = jax.random.split(key, 6)

    def uniform(k, shape, bound):
        return jax.random.uniform(k, shape, jnp.float32, -bound, bound)

    b1_bound = 1.0 / jnp.sqrt(float(in_dim))
    b2_bound = 1.0 / jnp.sqrt(float(h1))

    w1 = uniform(keys[0], (in_dim, h1), b1_bound)
    b1 = uniform(keys[1], (1, h1), b1_bound)
    w2 = uniform(keys[2], (h1, h2), b2_bound)
    b2 = uniform(keys[3], (1, h2), b2_bound)
    w3 = uniform(keys[4], (h2, 1), init_w)
    b3 = uniform(keys[5], (1, 1), init_w)
    return (w1, b1, w2, b2, w3, b3)


def critic_q_ref(state, action, params):
    """Pure-JAX reference for correctness check."""
    w1, b1, w2, b2, w3, b3 = params
    x = jnp.concatenate([state, action], axis=-1)
    x = jnp.maximum(x @ w1 + b1, 0.0)
    x = jnp.maximum(x @ w2 + b2, 0.0)
    return x @ w3 + b3


if __name__ == "__main__":
    key = jax.random.PRNGKey(0)
    k_state, k_action, k_params = jax.random.split(key, 3)

    state_dim = 24
    action_dim = 8
    in_dim = state_dim + action_dim  # 32
    n_layer = (128, 128)
    params = init_critic_q_params(k_params, in_dim, n_layer)

    # Case 1: small batch (single tile).
    B = 8
    state = jax.random.normal(k_state, (B, state_dim), jnp.float32)
    action = jax.random.normal(k_action, (B, action_dim), jnp.float32)

    value = critic_q_forward(state, action, params)
    value = jax.block_until_ready(value)
    ref = critic_q_ref(state, action, params)
    assert value.shape == (B, 1), value.shape
    assert jnp.allclose(value, ref, atol=1e-4, rtol=1e-4), (value, ref)

    # Case 2: batch not divisible by the tile (exercises the padding path).
    B2 = 13
    k_s2, k_a2 = jax.random.split(k_state)
    state2 = jax.random.normal(k_s2, (B2, state_dim), jnp.float32)
    action2 = jax.random.normal(k_a2, (B2, action_dim), jnp.float32)

    value2 = critic_q_forward(state2, action2, params)
    value2 = jax.block_until_ready(value2)
    ref2 = critic_q_ref(state2, action2, params)
    assert value2.shape == (B2, 1), value2.shape
    assert jnp.allclose(value2, ref2, atol=1e-4, rtol=1e-4), (value2, ref2)

    print("KERNEL_OK")
</pallas_src>

<mosaic_0001>
module attributes {stable_mosaic.version = 11 : i64} {
  func.func @critic_q_kernel(%arg0: i32, %arg1: memref<8x24xf32, #tpu.memory_space<vmem>>, %arg2: memref<8x8xf32, #tpu.memory_space<vmem>>, %arg3: memref<24x128xf32, #tpu.memory_space<vmem>>, %arg4: memref<8x128xf32, #tpu.memory_space<vmem>>, %arg5: memref<1x128xf32, #tpu.memory_space<vmem>>, %arg6: memref<128x128xf32, #tpu.memory_space<vmem>>, %arg7: memref<1x128xf32, #tpu.memory_space<vmem>>, %arg8: memref<1x128xf32, #tpu.memory_space<vmem>>, %arg9: memref<1x1xf32, #tpu.memory_space<smem>>, %arg10: memref<8x1xf32, #tpu.memory_space<vmem>>) attributes {dimension_semantics = [#tpu.dimension_semantics<parallel>], iteration_bounds = array<i64: 1>, scalar_prefetch = 0 : i64, scratch_operands = 0 : i64, tpu.core_type = #tpu.core_type<tc>, window_params = [{transform_indices = @transform_0, window_bounds = array<i64: 8, 24>}, {transform_indices = @transform_1, window_bounds = array<i64: 8, 8>}, {pipeline_mode = #tpu.pipeline_mode<synchronous>, transform_indices = @transform_2, window_bounds = array<i64: 24, 128>}, {pipeline_mode = #tpu.pipeline_mode<synchronous>, transform_indices = @transform_3, window_bounds = array<i64: 8, 128>}, {pipeline_mode = #tpu.pipeline_mode<synchronous>, transform_indices = @transform_4, window_bounds = array<i64: 1, 128>}, {pipeline_mode = #tpu.pipeline_mode<synchronous>, transform_indices = @transform_5, window_bounds = array<i64: 128, 128>}, {pipeline_mode = #tpu.pipeline_mode<synchronous>, transform_indices = @transform_6, window_bounds = array<i64: 1, 128>}, {pipeline_mode = #tpu.pipeline_mode<synchronous>, transform_indices = @transform_7, window_bounds = array<i64: 1, 128>}, {transform_indices = @transform_8, window_bounds = array<i64: 1, 1>}, {transform_indices = @transform_9, window_bounds = array<i64: 8, 1>}]} {
    %c0 = arith.constant 0 : index
    %c0_0 = arith.constant 0 : index
    %0 = vector.load %arg1[%c0, %c0_0] : memref<8x24xf32, #tpu.memory_space<vmem>>, vector<8x24xf32>
    %c0_1 = arith.constant 0 : index
    %c0_2 = arith.constant 0 : index
    %1 = vector.load %arg3[%c0_1, %c0_2] : memref<24x128xf32, #tpu.memory_space<vmem>>, vector<24x128xf32>
    %cst = arith.constant dense<0.000000e+00> : vector<8x128xf32>
    %2 = tpu.matmul %0, %1, %cst {dimension_numbers = #tpu.dot_dimension_numbers<[1], [0], [0], [1], [0, 0, 1, 1], [], []>} : vector<8x24xf32>, vector<24x128xf32>, vector<8x128xf32> -> vector<8x128xf32>
    %c0_3 = arith.constant 0 : index
    %c0_4 = arith.constant 0 : index
    %3 = vector.load %arg2[%c0_3, %c0_4] : memref<8x8xf32, #tpu.memory_space<vmem>>, vector<8x8xf32>
    %c0_5 = arith.constant 0 : index
    %c0_6 = arith.constant 0 : index
    %4 = vector.load %arg4[%c0_5, %c0_6] : memref<8x128xf32, #tpu.memory_space<vmem>>, vector<8x128xf32>
    %cst_7 = arith.constant dense<0.000000e+00> : vector<8x128xf32>
    %5 = tpu.matmul %3, %4, %cst_7 {dimension_numbers = #tpu.dot_dimension_numbers<[1], [0], [0], [1], [0, 0, 1, 1], [], []>} : vector<8x8xf32>, vector<8x128xf32>, vector<8x128xf32> -> vector<8x128xf32>
    %6 = arith.addf %2, %5 : vector<8x128xf32>
    %c0_8 = arith.constant 0 : index
    %c0_9 = arith.constant 0 : index
    %7 = vector.load %arg5[%c0_8, %c0_9] : memref<1x128xf32, #tpu.memory_space<vmem>>, vector<1x128xf32>
    %8 = vector.broadcast %7 : vector<1x128xf32> to vector<8x128xf32>
    %9 = arith.addf %6, %8 : vector<8x128xf32>
    %cst_10 = arith.constant 0.000000e+00 : f32
    %10 = vector.broadcast %cst_10 : f32 to vector<8x128xf32>
    %11 = arith.maximumf %9, %10 : vector<8x128xf32>
    %c0_11 = arith.constant 0 : index
    %c0_12 = arith.constant 0 : index
    %12 = vector.load %arg6[%c0_11, %c0_12] : memref<128x128xf32, #tpu.memory_space<vmem>>, vector<128x128xf32>
    %cst_13 = arith.constant dense<0.000000e+00> : vector<8x128xf32>
    %13 = tpu.matmul %11, %12, %cst_13 {dimension_numbers = #tpu.dot_dimension_numbers<[1], [0], [0], [1], [0, 0, 1, 1], [], []>} : vector<8x128xf32>, vector<128x128xf32>, vector<8x128xf32> -> vector<8x128xf32>
    %c0_14 = arith.constant 0 : index
    %c0_15 = arith.constant 0 : index
    %14 = vector.load %arg7[%c0_14, %c0_15] : memref<1x128xf32, #tpu.memory_space<vmem>>, vector<1x128xf32>
    %15 = vector.broadcast %14 : vector<1x128xf32> to vector<8x128xf32>
    %16 = arith.addf %13, %15 : vector<8x128xf32>
    %cst_16 = arith.constant 0.000000e+00 : f32
    %17 = vector.broadcast %cst_16 : f32 to vector<8x128xf32>
    %18 = arith.maximumf %16, %17 : vector<8x128xf32>
    %c0_17 = arith.constant 0 : index
    %c0_18 = arith.constant 0 : index
    %19 = vector.load %arg8[%c0_17, %c0_18] : memref<1x128xf32, #tpu.memory_space<vmem>>, vector<1x128xf32>
    %20 = vector.broadcast %19 : vector<1x128xf32> to vector<8x128xf32>
    %21 = arith.mulf %18, %20 : vector<8x128xf32>
    %cst_19 = arith.constant dense<0.000000e+00> : vector<8xf32>
    %22 = vector.multi_reduction <add>, %21, %cst_19 [1] : vector<8x128xf32> to vector<8xf32>
    %23 = vector.shape_cast %22 : vector<8xf32> to vector<8x1xf32>
    %c0_20 = arith.constant 0 : index
    %c0_21 = arith.constant 0 : index
    %24 = memref.load %arg9[%c0_20, %c0_21] : memref<1x1xf32, #tpu.memory_space<smem>>
    %25 = vector.broadcast %24 : f32 to vector<8x1xf32>
    %26 = arith.addf %23, %25 : vector<8x1xf32>
    %c0_22 = arith.constant 0 : index
    %c0_23 = arith.constant 0 : index
    %27 = vector.load %arg10[%c0_22, %c0_23] : memref<8x1xf32, #tpu.memory_space<vmem>>, vector<8x1xf32>
    tpu.vector_store %arg10[%c0_22, %c0_23], %26 {strides = array<i32>} : memref<8x1xf32, #tpu.memory_space<vmem>>, vector<8x1xf32>,
    return
  }
  func.func @transform_0(%arg0: i32) -> (i32, i32) {
    %c0_i32 = arith.constant 0 : i32
    %c0_i32_0 = arith.constant 0 : i32
    return %arg0, %c0_i32 : i32, i32
  }
  func.func @transform_1(%arg0: i32) -> (i32, i32) {
    %c0_i32 = arith.constant 0 : i32
    %c0_i32_0 = arith.constant 0 : i32
    return %arg0, %c0_i32 : i32, i32
  }
  func.func @transform_2(%arg0: i32) -> (i32, i32) {
    %c0_i32 = arith.constant 0 : i32
    %c0_i32_0 = arith.constant 0 : i32
    %c0_i32_1 = arith.constant 0 : i32
    return %c0_i32, %c0_i32_0 : i32, i32
  }
  func.func @transform_3(%arg0: i32) -> (i32, i32) {
    %c0_i32 = arith.constant 0 : i32
    %c0_i32_0 = arith.constant 0 : i32
    %c0_i32_1 = arith.constant 0 : i32
    return %c0_i32, %c0_i32_0 : i32, i32
  }
  func.func @transform_4(%arg0: i32) -> (i32, i32) {
    %c0_i32 = arith.constant 0 : i32
    %c0_i32_0 = arith.constant 0 : i32
    %c0_i32_1 = arith.constant 0 : i32
    return %c0_i32, %c0_i32_0 : i32, i32
  }
  func.func @transform_5(%arg0: i32) -> (i32, i32) {
    %c0_i32 = arith.constant 0 : i32
    %c0_i32_0 = arith.constant 0 : i32
    %c0_i32_1 = arith.constant 0 : i32
    return %c0_i32, %c0_i32_0 : i32, i32
  }
  func.func @transform_6(%arg0: i32) -> (i32, i32) {
    %c0_i32 = arith.constant 0 : i32
    %c0_i32_0 = arith.constant 0 : i32
    %c0_i32_1 = arith.constant 0 : i32
    return %c0_i32, %c0_i32_0 : i32, i32
  }
  func.func @transform_7(%arg0: i32) -> (i32, i32) {
    %c0_i32 = arith.constant 0 : i32
    %c0_i32_0 = arith.constant 0 : i32
    %c0_i32_1 = arith.constant 0 : i32
    return %c0_i32, %c0_i32_0 : i32, i32
  }
  func.func @transform_8(%arg0: i32) -> (i32, i32) {
    %c0_i32 = arith.constant 0 : i32
    %c0_i32_0 = arith.constant 0 : i32
    %c0_i32_1 = arith.constant 0 : i32
    return %c0_i32, %c0_i32_0 : i32, i32
  }
  func.func @transform_9(%arg0: i32) -> (i32, i32) {
    %c0_i32 = arith.constant 0 : i32
    %c0_i32_0 = arith.constant 0 : i32
    return %arg0, %c0_i32 : i32, i32
  }
}

</mosaic_0001>

<bundles_post_ra>
// kernel: tpu_custom_call.1
= control target key start
LH: loop header
LB: loop body
LE: loop exit
PB: predicated region body
PF: predicated region fallthrough
CT: control target
= control target key end

     0   :  { %15 = vsyncpa [#allocation4], 0  ;;  %s678_s0 = inlined_call_operand.hbm [shape: f32[8,24], index: 0, kind: input, shape index: {}]   ;;  %s679_s1 = inlined_call_operand.hbm [shape: f32[8,8], index: 1, kind: input, shape index: {}]   ;;  %s680_s2 = inlined_call_operand.hbm [shape: f32[24,128], index: 2, kind: input, shape index: {}]   ;;  %s681_s3 = inlined_call_operand.hbm [shape: f32[8,128], index: 3, kind: input, shape index: {}]   ;;  %s682_s4 = inlined_call_operand.vmem [shape: f32[1,128], index: 4, kind: input, shape index: {}]   ;;  %s683_s5 = inlined_call_operand.hbm [shape: f32[128,128], index: 5, kind: input, shape index: {}]   ;;  %s684_s6 = inlined_call_operand.vmem [shape: f32[1,128], index: 6, kind: input, shape index: {}]   ;;  %s685_s7 = inlined_call_operand.vmem [shape: f32[1,128], index: 7, kind: input, shape index: {}]   ;;  %s686_s8 = inlined_call_operand.<no memory space> [shape: f32[1,1], index: 8, kind: input, shape index: {}]   ;;  %s687_s9 = inlined_call_operand.vmem [shape: f32[8,1], index: 9, kind: output, shape index: {}]  }
   0x1   :  { %16 = vsyncpa [#allocation6], 0 }
   0x2   :  { %17 = vsyncpa [#allocation9], 0  ;;  %s566_s30 = smov [#allocation5]   ;;  %s567_s11 = smov [#allocation8]  }
   0x3   :  { %s34_s10 = sshll.u32 %s566_s30, 4  ;;  %s56_s12 = sshll.u32 %s567_s11, 4  ;;  %s35_s10 = int_to_ptr.vmem [resolvable:$true] %s34_s10  ;;  %s57_s12 = int_to_ptr.vmem [resolvable:$true] %s56_s12 }
   0x4   :  { %s468_s13 = scalar_lea.vmem %s35_s10, 128  ;;  %p473_p1 = scmp.lt.s32.totalorder %s35_s10, %s35_s10 }
   0x5   :  { %p469_p0 = scmp.ne.s32.totalorder %s35_s10, %s468_s13  ;;  %p474_p2 = scmp.lt.s32.totalorder %s468_s13, %s468_s13 }
   0x7   :  { %p475_p3 = por %p474_p2, %p473_p1 }
   0x9   :  { %p476_p4 = pnand %p475_p3, %p469_p0 }
   0xb   :  { %479 = shalt.err (!%p476_p4)
}
   0xc   :  { %37 = dma.hbm_to_vmem [thread:$0]  %s679_s1, 128, %s35_s10, [#allocation6]  }
   0xd   :  { %s488_s16 = scalar_lea.vmem %s57_s12, 128  ;;  %p493_p6 = scmp.lt.s32.totalorder %s57_s12, %s57_s12 }
   0xe   :  { %p489_p5 = scmp.ne.s32.totalorder %s57_s12, %s488_s16  ;;  %p494_p7 = scmp.lt.s32.totalorder %s488_s16, %s488_s16 }
  0x10   :  { %p495_p8 = por %p494_p7, %p493_p6 }
  0x12   :  { %p496_p9 = pnand %p495_p8, %p489_p5 }
  0x14   :  { %499 = shalt.err (!%p496_p9)
}
  0x15   :  { %59 = dma.hbm_to_vmem [thread:$0]  %s681_s3, 128, %s57_s12, [#allocation9]  }
  0x16   :  { %s568_s19 = smov [#allocation3]   ;;  %s569_s21 = smov [#allocation7]  }
  0x17   :  { %s24_s20 = sshll.u32 %s568_s19, 4  ;;  %s43_s22 = sshll.u32 %s569_s21, 4  ;;  %s25_s20 = int_to_ptr.vmem [resolvable:$true] %s24_s20  ;;  %s44_s22 = int_to_ptr.vmem [resolvable:$true] %s43_s22 }
  0x18   :  { %s508_s23 = scalar_lea.vmem %s25_s20, 128  ;;  %p513_p11 = scmp.lt.s32.totalorder %s25_s20, %s25_s20 }
  0x19   :  { %p509_p10 = scmp.ne.s32.totalorder %s25_s20, %s508_s23  ;;  %p514_p12 = scmp.lt.s32.totalorder %s508_s23, %s508_s23 }
  0x1b   :  { %p515_p13 = por %p514_p12, %p513_p11 }
  0x1d   :  { %p516_p0 = pnand %p515_p13, %p509_p10 }
  0x1f   :  { %519 = shalt.err (!%p516_p0)
}
  0x20   :  { %27 = dma.hbm_to_vmem [thread:$0]  %s678_s0, 128, %s25_s20, [#allocation4]  }
  0x21   :  { %s528_s25 = scalar_lea.vmem %s44_s22, 384  ;;  %p533_p2 = scmp.lt.s32.totalorder %s44_s22, %s44_s22 }
  0x22   :  { %p529_p1 = scmp.ne.s32.totalorder %s44_s22, %s528_s25  ;;  %p534_p3 = scmp.lt.s32.totalorder %s528_s25, %s528_s25 }
  0x24   :  { %p535_p4 = por %p534_p3, %p533_p2 }
  0x26   :  { %p536_p5 = pnand %p535_p4, %p529_p1 }
  0x28   :  { %539 = shalt.err (!%p536_p5)
}
  0x29   :  { %s570_s3 = smov 128   ;;  %s571_s26 = smov 8  }
  0x2a   :  { %49 = dma.hbm_to_vmem [thread:$0]  %s680_s2, 384, %s44_s22, [#allocation6], %s570_s3, %s570_s3, %s571_s26  }
  0x2b   :  { %s572_s29 = smov [#allocation10]  }
  0x2c   :  { %s67_s30 = sshll.u32 %s572_s29, 4  ;;  %s68_s30 = int_to_ptr.vmem [resolvable:$true] %s67_s30 }
  0x2d   :  { %s548_s10 = scalar_lea.vmem %s68_s30, 2048  ;;  %p553_p7 = scmp.lt.s32.totalorder %s68_s30, %s68_s30 }
  0x2e   :  { %p549_p6 = scmp.ne.s32.totalorder %s68_s30, %s548_s10  ;;  %p554_p8 = scmp.lt.s32.totalorder %s548_s10, %s548_s10 }
  0x30   :  { %p555_p9 = por %p554_p8, %p553_p7 }
  0x32   :  { %p556_p10 = pnand %p555_p9, %p549_p6 }
  0x34   :  { %559 = shalt.err (!%p556_p10)
}
  0x35   :  { %73 = dma.hbm_to_vmem [thread:$0]  %s683_s5, 2048, %s68_s30, [#allocation9], %s570_s3, %s570_s3, %s571_s26  }
  0x36   :  { %560 = dma.done.wait [#allocation4], 128  }
  0x37   :  { %561 = vsyncadd [#allocation4], 4294967168 }
  0x38   :  { %562 = dma.done.wait [#allocation6], 512  }
  0x39   :  { %563 = vsyncadd [#allocation6], 4294966784 }
  0x3a   :  { %564 = dma.done.wait [#allocation9], 2176  }
  0x3b   :  { %565 = vsyncadd [#allocation9], 4294965120  ;;  %v573_v0 = vmov 0.0   ;;  %vm574_vm0 = vmmov 0   ;;  %vm101_vm1 = vcmask 64512   ;;  %v100_v1 = vld [vmem:[#allocation8] sm:$0xff]  ;;  %v363_v38 = vstv %s686_s8 }
  0x3c   :  { %402 = vmatprep.subr.mxu1 %v573_v0  ;;  %404 = vmatprep.mubr.msk.f32.mxu1 %vm574_vm0, %v573_v0  ;;  %v99_v2 = vld [vmem:[#allocation5] sm:$0xff]  ;;  %v98_v3 = vld [vmem:[#allocation7 + $0x10] sm:$0xff]  ;;  %v97_v4 = vld [vmem:[#allocation7 + $0x8] sm:$0xff]  ;;  %vm175_vm2 = vcmask 195584   ;;  %vm365_vm3 = vcmask 7168  }
  0x3d   :  { %416 = vmatprep.subr.mxu0 %v573_v0  ;;  %448 = vmatprep.mubr.msk.f32.mxu0 %vm574_vm0, %v573_v0  ;;  %v273_v5 = vld [vmem:[#allocation10 + $0x78] sm:$0xff]  ;;  %v272_v6 = vld [vmem:[#allocation10 + $0x70] sm:$0xff]  ;;  %v96_v7 = vld [vmem:[#allocation7] sm:$0xff] }
  0x3e   :  { %403 = vmatpush3.msra.mxu1 %v100_v1  ;;  %417 = vmatpush3.msra.mxu0 %v273_v5  ;;  %v95_v8 = vld [vmem:[#allocation3] sm:$0xff]  ;;  %v271_v9 = vld [vmem:[#allocation10 + $0x68] sm:$0xff]  ;;  %v270_v10 = vld [vmem:[#allocation10 + $0x60] sm:$0xff] }
  0x3f   :  { %405 = vmatmul.mubr.msk.f32.vlgmr.msra.gmra.mxu1 %vm101_vm1, %v99_v2  ;;  %407 = vmatprep.subr.mxu1 %v573_v0  ;;  %v269_v11 = vld [vmem:[#allocation10 + $0x58] sm:$0xff]  ;;  %v268_v12 = vld [vmem:[#allocation10 + $0x50] sm:$0xff]  ;;  %v267_v13 = vld [vmem:[#allocation10 + $0x48] sm:$0xff] }
  0x40   :  { %408 = vmatpush3.msra.mxu1 %v98_v3  ;;  %413 = vmatprep.mubr.msk.f32.mxu1 %vm574_vm0, %v573_v0  ;;  %v266_v14 = vld [vmem:[#allocation10 + $0x40] sm:$0xff]  ;;  %v265_v15 = vld [vmem:[#allocation10 + $0x38] sm:$0xff]  ;;  %v264_v16 = vld [vmem:[#allocation10 + $0x30] sm:$0xff] }
  0x41   :  { %409 = vmatprep.subr.mxu1 %v573_v0  ;;  %418 = vmatprep.subr.mxu0 %v573_v0  ;;  %v263_v17 = vld [vmem:[#allocation10 + $0x28] sm:$0xff]  ;;  %v262_v18 = vld [vmem:[#allocation10 + $0x20] sm:$0xff]  ;;  %v261_v19 = vld [vmem:[#allocation10 + $0x18] sm:$0xff] }
  0x42   :  { %410 = vmatpush3.msra.mxu1 %v97_v4  ;;  %419 = vmatpush3.msra.mxu0 %v272_v6  ;;  %v260_v20 = vld [vmem:[#allocation10 + $0x10] sm:$0xff]  ;;  %v259_v21 = vld [vmem:[#allocation10 + $0x8] sm:$0xff]  ;;  %v258_v22 = vld [vmem:[#allocation10] sm:$0xff] }
  0x43   :  { %411 = vmatprep.subr.mxu1 %v573_v0  ;;  %420 = vmatprep.subr.mxu0 %v573_v0  ;;  %v376_v26 = vld [vmem:[%s682_s4] ss:$0 sm:$0xff] }
  0x44   :  { %412 = vmatpush3.msra.mxu1 %v96_v7  ;;  %421 = vmatpush3.msra.mxu0 %v271_v9  ;;  %v377_v31 = vld [vmem:[%s684_s6] ss:$0 sm:$0xff] }
  0x45   :  { %414 = vmatmul.mubr.msk.f32.vlgmr.msra.gmra.mxu1 %vm175_vm2, %v95_v8  ;;  %422 = vmatprep.subr.mxu0 %v573_v0  ;;  %v378_v35 = vld [vmem:[%s685_s7] ss:$0 sm:$0xff] }
  0x46   :  { %423 = vmatpush3.msra.mxu0 %v270_v10 }
  0x47   :  { %424 = vmatprep.subr.mxu0 %v573_v0 }
  0x48   :  { %425 = vmatpush3.msra.mxu0 %v269_v11 }
  0x49   :  { %426 = vmatprep.subr.mxu0 %v573_v0 }
  0x4a   :  { %427 = vmatpush3.msra.mxu0 %v268_v12 }
  0x4b   :  { %428 = vmatprep.subr.mxu0 %v573_v0 }
  0x4c   :  { %429 = vmatpush3.msra.mxu0 %v267_v13 }
  0x4d   :  { %430 = vmatprep.subr.mxu0 %v573_v0 }
  0x4e   :  { %431 = vmatpush3.msra.mxu0 %v266_v14 }
  0x4f   :  { %432 = vmatprep.subr.mxu0 %v573_v0 }
  0x50   :  { %433 = vmatpush3.msra.mxu0 %v265_v15 }
  0x51   :  { %434 = vmatprep.subr.mxu0 %v573_v0 }
  0x52   :  { %435 = vmatpush3.msra.mxu0 %v264_v16 }
  0x53   :  { %436 = vmatprep.subr.mxu0 %v573_v0 }
  0x54   :  { %437 = vmatpush3.msra.mxu0 %v263_v17 }
  0x55   :  { %438 = vmatprep.subr.mxu0 %v573_v0 }
  0x56   :  { %439 = vmatpush3.msra.mxu0 %v262_v18 }
  0x57   :  { %440 = vmatprep.subr.mxu0 %v573_v0 }
  0x58   :  { %441 = vmatpush3.msra.mxu0 %v261_v19 }
  0x59   :  { %442 = vmatprep.subr.mxu0 %v573_v0 }
  0x5a   :  { %443 = vmatpush3.msra.mxu0 %v260_v20 }
  0x5b   :  { %444 = vmatprep.subr.mxu0 %v573_v0 }
  0x5c   :  { %445 = vmatpush3.msra.mxu0 %v259_v21 }
  0x5d   :  { %446 = vmatprep.subr.mxu0 %v573_v0 }
  0x5e   :  { %447 = vmatpush3.msra.mxu0 %v258_v22 }
  0xff   :  { %v171_v23 = vpop.f32.mrf.mxu1 }
 0x101   :  { %v406_v24 = vpop.f32.mrf.mxu1 }
 0x105   :  { %v245_v25 = vpop.f32.mrf.mxu1 }
 0x106   :  { %v246_v27 = vadd.f32 %v245_v25, %v171_v23 }
 0x107   :  { %v415_v28 = vpop.f32.mrf.mxu1 }
 0x108   :  { %v256_v29 = vadd.f32 %v376_v26, %v246_v27 }
 0x10a   :  { %v257_v30 = vmax.f32 %v256_v29, 0.0 }
 0x10c   :  { %449 = vmatmul.mubr.f32.vlgmr.msra.gmra.mxu0 %v257_v30 }
 0x1cc   :  { %v347_v32 = vpop.f32.mrf.mxu0 }
 0x1cd   :  { %v348_v33 = vadd.f32 %v377_v31, %v347_v32 }
 0x1ce   :  { %v450_v34 = vpop.f32.mrf.mxu0 }
 0x1cf   :  { %v351_v36 = vmax.f32 %v348_v33, 0.0 }
 0x1d1   :  { %v359_v37 = vmul.f32 %v378_v35, %v351_v36 }
 0x1d3   :  { %360 = vadd.xlane.f32.xlu0 %v359_v37 }
 0x25c   :  { %v361_v39 = vpop.xlane.xlu0 %360 }
 0x25d   :  { %v364_v40 = vadd.f32 %v363_v38, %v361_v39 }
 0x25f   :  { %366 = vst.msk [vmem:[%s687_s9] sm:$0xff] %vm365_vm3, %v364_v40 }
 0x260   :  { %371 = vsyncpa [#allocation4], 1 }
 0x261   :  { %372 = vsyncpa [#allocation6], 1 }
 0x262   :  { %373 = vsyncpa [#allocation9], 1 }

</bundles_post_ra>
